<compile_context>
chip_gen: v6e
topology: v6e:2x2x1
jax: 0.10.0
libtpu: 0.0.40
codegen_flags: <defaults>
</compile_context>

<pallas_src>
import functools

import jax
import jax.numpy as jnp
from jax.experimental import pallas as pl
from jax.experimental.pallas import tpu as pltpu

LANE = 128
ROWS_PER_TILE = 4096   # (4096, 128) f32 tile = 2 MiB per input per buffer


def _num_parallel_cores():
    """Grid-parallel TensorCores per device (1 on v2/v3/v5e/v6e, 2 on v4/v5p/v7x)."""
    try:
        kind = jax.devices()[0].device_kind.lower()
    except Exception:
        return 1
    for tag in ("v2", "v3", "v5 lite", "v5e", "v5lite", "v6", "trillium"):
        if tag in kind:
            return 1
    for tag in ("v5p", "v4", "7x", "v7"):
        if tag in kind:
            return 2
    return 1


def _masked_l1_kernel(p_ref, g_ref, out_ref, acc_sum_ref, acc_cnt_ref, *,
                      threshold, inv_threshold, block_rows, inner_tiles,
                      rows, need_mask):
    t = pl.program_id(1)

    @pl.when(t == 0)
    def _():
        acc_sum_ref[...] = jnp.zeros_like(acc_sum_ref)
        acc_cnt_ref[...] = jnp.zeros_like(acc_cnt_ref)

    # Upcast per tile (inputs may stream as bf16 -> half the HBM bytes).
    g = g_ref[...].astype(jnp.float32)
    p = p_ref[...].astype(jnp.float32)

    valid = g > 0.0
    if need_mask:
        # Only compiled in for ragged final tiles / duplicated clamped tiles of
        # an uneven dual-core split.  Uses the *unclamped* tile index so a
        # duplicated tile contributes nothing (no double counting).
        s = pl.program_id(0)
        tile_idx = s * inner_tiles + t
        local_row = jax.lax.broadcasted_iota(jnp.int32, (block_rows, LANE), 0)
        valid = valid & ((tile_idx * block_rows + local_row) < rows)

    g_scaled = jnp.minimum(g, threshold) * inv_threshold
    diff = jnp.where(valid, jnp.abs(g_scaled - p), 0.0)

    # Per-step reduce to a single (1, 128) partial before accumulating:
    # block_rows/8 VALU vreg-adds + one in-vreg cross-sublane fold (XLU slot,
    # otherwise idle here).  Accumulator RMW is a single vreg per array.
    acc_sum_ref[...] += jnp.sum(diff, axis=0, keepdims=True)
    acc_cnt_ref[...] += jnp.sum(valid.astype(jnp.float32), axis=0, keepdims=True)

    @pl.when(t == pl.num_programs(1) - 1)
    def _():
        out_ref[0, 0:1, :] = acc_sum_ref[...]
        out_ref[0, 1:2, :] = acc_cnt_ref[...]


def masked_l1_loss(prediction, target, threshold=100.0):
    """prediction: (N, 1, H, W); target: (N, H, W) -> scalar f32 (NaN if no valid px)."""
    pred = jnp.squeeze(prediction, axis=1)
    gt = target

    # Keep native f32/bf16 in HBM (kernel upcasts per tile); other dtypes -> f32.
    if pred.dtype not in (jnp.float32, jnp.bfloat16):
        pred = pred.astype(jnp.float32)
    if gt.dtype not in (jnp.float32, jnp.bfloat16):
        gt = gt.astype(jnp.float32)

    p_flat = pred.reshape(-1)
    g_flat = gt.reshape(-1)
    total = p_flat.shape[0]

    # Zero-copy lane-dense view when numel % 128 == 0 (the common case for
    # image shapes); otherwise pad the <128-element tail (gt pad = 0 -> invalid).
    rem = total % LANE
    if rem:
        p_flat = jnp.pad(p_flat, (0, LANE - rem))
        g_flat = jnp.pad(g_flat, (0, LANE - rem))
    rows = p_flat.shape[0] // LANE

    p2d = p_flat.reshape(rows, LANE)
    g2d = g_flat.reshape(rows, LANE)

    block_rows = min(ROWS_PER_TILE, rows)
    n_tiles = pl.cdiv(rows, block_rows)

    nsplit = min(_num_parallel_cores(), n_tiles)
    inner = pl.cdiv(n_tiles, nsplit)
    even_split = (nsplit * inner == n_tiles)
    need_mask = (rows % block_rows != 0) or (not even_split)

    if even_split:
        def in_map(s, t):
            return (s * inner + t, 0)
    else:
        # Uneven dual-core split: the trailing out-of-range step re-reads the
        # final in-bounds tile; the in-kernel row mask zeroes its contribution.
        def in_map(s, t):
            return (jnp.minimum(s * inner + t, n_tiles - 1), 0)

    kernel = functools.partial(
        _masked_l1_kernel,
        threshold=float(threshold),
        inv_threshold=1.0 / float(threshold),
        block_rows=block_rows,
        inner_tiles=inner,
        rows=rows,
        need_mask=need_mask,
    )

    partials = pl.pallas_call(
        kernel,
        out_shape=jax.ShapeDtypeStruct((nsplit, 2, LANE), jnp.float32),
        grid_spec=pltpu.PrefetchScalarGridSpec(
            num_scalar_prefetch=0,
            grid=(nsplit, inner),
            in_specs=[
                pl.BlockSpec((block_rows, LANE), in_map),
                pl.BlockSpec((block_rows, LANE), in_map),
            ],
            out_specs=pl.BlockSpec((1, 2, LANE), lambda s, t: (s, 0, 0)),
            scratch_shapes=[
                pltpu.VMEM((1, LANE), jnp.float32),
                pltpu.VMEM((1, LANE), jnp.float32),
            ],
        ),
        compiler_params=pltpu.CompilerParams(
            dimension_semantics=("parallel", "arbitrary"),
        ),
    )(p2d, g2d)

    total_sum = jnp.sum(partials[:, 0, :])
    total_cnt = jnp.sum(partials[:, 1, :])
    # count == 0 -> 0/0 -> NaN, matching the torch reference's behavior.
    return total_sum / total_cnt


def _reference(prediction, target, threshold=100.0):
    pred = jnp.squeeze(prediction, axis=1)
    valid = target > 0
    gt = jnp.minimum(target, threshold) / threshold
    num = jnp.sum(jnp.where(valid, jnp.abs(gt - pred), 0.0))
    cnt = jnp.sum(valid)
    return num / cnt


if __name__ == "__main__":
    key = jax.random.PRNGKey(0)
    k1, k2 = jax.random.split(key)
    N, H, W = 2, 16, 16
    prediction = jax.random.uniform(k1, (N, 1, H, W), dtype=jnp.float32)
    # target: mix of zeros (invalid), moderate values, and values above threshold
    target = jax.random.uniform(k2, (N, H, W), dtype=jnp.float32, minval=-20.0,
                                maxval=150.0)
    target = jnp.where(target < 0.0, 0.0, target)  # ~13% invalid entries

    loss = masked_l1_loss(prediction, target, threshold=100.0)
    loss = jax.block_until_ready(loss)

    ref = _reference(prediction, target, threshold=100.0)
    assert jnp.allclose(loss, ref, rtol=1e-5, atol=1e-6), (loss, ref)
    print("KERNEL_OK")
</pallas_src>

<mosaic_0001>
module attributes {stable_mosaic.version = 11 : i64} {
  func.func @_masked_l1_kernel(%arg0: i32, %arg1: i32, %arg2: memref<4x128xf32, #tpu.memory_space<vmem>>, %arg3: memref<4x128xf32, #tpu.memory_space<vmem>>, %arg4: memref<1x2x128xf32, #tpu.memory_space<vmem>>, %arg5: memref<1x128xf32, #tpu.memory_space<vmem>>, %arg6: memref<1x128xf32, #tpu.memory_space<vmem>>) attributes {dimension_semantics = [#tpu.dimension_semantics<parallel>, #tpu.dimension_semantics<arbitrary>], iteration_bounds = array<i64: 1, 1>, scalar_prefetch = 0 : i64, scratch_operands = 2 : i64, tpu.core_type = #tpu.core_type<tc>, window_params = [{transform_indices = @transform_0, window_bounds = array<i64: 4, 128>}, {transform_indices = @transform_1, window_bounds = array<i64: 4, 128>}, {transform_indices = @transform_2, window_bounds = array<i64: 1, 2, 128>}]} {
    %c0_i32 = arith.constant 0 : i32
    %0 = arith.cmpi eq, %arg1, %c0_i32 : i32
    %1 = arith.extui %0 : i1 to i32
    %c0_i32_0 = arith.constant 0 : i32
    %2 = arith.cmpi ne, %1, %c0_i32_0 : i32
    scf.if %2 {
      %cst_19 = arith.constant 0.000000e+00 : f32
      %30 = vector.broadcast %cst_19 : f32 to vector<1x128xf32>
      %c0_20 = arith.constant 0 : index
      %c0_21 = arith.constant 0 : index
      %31 = vector.load %arg5[%c0_20, %c0_21] : memref<1x128xf32, #tpu.memory_space<vmem>>, vector<1x128xf32>
      tpu.vector_store %arg5[%c0_20, %c0_21], %30 {strides = array<i32>} : memref<1x128xf32, #tpu.memory_space<vmem>>, vector<1x128xf32>,
      %cst_22 = arith.constant 0.000000e+00 : f32
      %32 = vector.broadcast %cst_22 : f32 to vector<1x128xf32>
      %c0_23 = arith.constant 0 : index
      %c0_24 = arith.constant 0 : index
      %33 = vector.load %arg6[%c0_23, %c0_24] : memref<1x128xf32, #tpu.memory_space<vmem>>, vector<1x128xf32>
      tpu.vector_store %arg6[%c0_23, %c0_24], %32 {strides = array<i32>} : memref<1x128xf32, #tpu.memory_space<vmem>>, vector<1x128xf32>,
    } else {
    }
    %c0 = arith.constant 0 : index
    %c0_1 = arith.constant 0 : index
    %3 = vector.load %arg3[%c0, %c0_1] : memref<4x128xf32, #tpu.memory_space<vmem>>, vector<4x128xf32>
    %c0_2 = arith.constant 0 : index
    %c0_3 = arith.constant 0 : index
    %4 = vector.load %arg2[%c0_2, %c0_3] : memref<4x128xf32, #tpu.memory_space<vmem>>, vector<4x128xf32>
    %cst = arith.constant 0.000000e+00 : f32
    %5 = vector.broadcast %cst : f32 to vector<4x128xf32>
    %6 = arith.cmpf ogt, %3, %5 : vector<4x128xf32>
    %cst_4 = arith.constant 1.000000e+02 : f32
    %7 = vector.broadcast %cst_4 : f32 to vector<4x128xf32>
    %8 = arith.minimumf %3, %7 : vector<4x128xf32>
    %cst_5 = arith.constant 0.00999999977 : f32
    %9 = vector.broadcast %cst_5 : f32 to vector<4x128xf32>
    %10 = arith.mulf %8, %9 : vector<4x128xf32>
    %11 = arith.subf %10, %4 : vector<4x128xf32>
    %12 = math.absf %11 : vector<4x128xf32>
    %cst_6 = arith.constant 0.000000e+00 : f32
    %13 = vector.broadcast %cst_6 : f32 to vector<4x128xf32>
    %14 = arith.select %6, %12, %13 : vector<4x128xi1>, vector<4x128xf32>
    %c0_7 = arith.constant 0 : index
    %c0_8 = arith.constant 0 : index
    %15 = vector.load %arg5[%c0_7, %c0_8] : memref<1x128xf32, #tpu.memory_space<vmem>>, vector<1x128xf32>
    %cst_9 = arith.constant dense<0.000000e+00> : vector<128xf32>
    %16 = vector.multi_reduction <add>, %14, %cst_9 [0] : vector<4x128xf32> to vector<128xf32>
    %17 = vector.shape_cast %16 : vector<128xf32> to vector<1x128xf32>
    %18 = arith.addf %15, %17 : vector<1x128xf32>
    %c0_10 = arith.constant 0 : index
    %c0_11 = arith.constant 0 : index
    %19 = vector.load %arg5[%c0_10, %c0_11] : memref<1x128xf32, #tpu.memory_space<vmem>>, vector<1x128xf32>
    tpu.vector_store %arg5[%c0_10, %c0_11], %18 {strides = array<i32>} : memref<1x128xf32, #tpu.memory_space<vmem>>, vector<1x128xf32>,
    %c0_12 = arith.constant 0 : index
    %c0_13 = arith.constant 0 : index
    %20 = vector.load %arg6[%c0_12, %c0_13] : memref<1x128xf32, #tpu.memory_space<vmem>>, vector<1x128xf32>
    %21 = arith.extui %6 : vector<4x128xi1> to vector<4x128xi32>
    %22 = arith.sitofp %21 : vector<4x128xi32> to vector<4x128xf32>
    %cst_14 = arith.constant dense<0.000000e+00> : vector<128xf32>
    %23 = vector.multi_reduction <add>, %22, %cst_14 [0] : vector<4x128xf32> to vector<128xf32>
    %24 = vector.shape_cast %23 : vector<128xf32> to vector<1x128xf32>
    %25 = arith.addf %20, %24 : vector<1x128xf32>
    %c0_15 = arith.constant 0 : index
    %c0_16 = arith.constant 0 : index
    %26 = vector.load %arg6[%c0_15, %c0_16] : memref<1x128xf32, #tpu.memory_space<vmem>>, vector<1x128xf32>
    tpu.vector_store %arg6[%c0_15, %c0_16], %25 {strides = array<i32>} : memref<1x128xf32, #tpu.memory_space<vmem>>, vector<1x128xf32>,
    %c0_i32_17 = arith.constant 0 : i32
    %27 = arith.cmpi eq, %arg1, %c0_i32_17 : i32
    %28 = arith.extui %27 : i1 to i32
    %c0_i32_18 = arith.constant 0 : i32
    %29 = arith.cmpi ne, %28, %c0_i32_18 : i32
    scf.if %29 {
      %c0_19 = arith.constant 0 : index
      %c0_20 = arith.constant 0 : index
      %30 = vector.load %arg5[%c0_19, %c0_20] : memref<1x128xf32, #tpu.memory_space<vmem>>, vector<1x128xf32>
      %c0_21 = arith.constant 0 : index
      %c0_22 = arith.constant 0 : index
      %c0_23 = arith.constant 0 : index
      %31 = vector.load %arg4[%c0_21, %c0_22, %c0_23] : memref<1x2x128xf32, #tpu.memory_space<vmem>>, vector<1x1x128xf32>
      %32 = vector.shape_cast %31 : vector<1x1x128xf32> to vector<1x128xf32>
      %33 = vector.shape_cast %30 : vector<1x128xf32> to vector<1x1x128xf32>
      tpu.vector_store %arg4[%c0_21, %c0_22, %c0_23], %33 {strides = array<i32>} : memref<1x2x128xf32, #tpu.memory_space<vmem>>, vector<1x1x128xf32>,
      %c0_24 = arith.constant 0 : index
      %c0_25 = arith.constant 0 : index
      %34 = vector.load %arg6[%c0_24, %c0_25] : memref<1x128xf32, #tpu.memory_space<vmem>>, vector<1x128xf32>
      %c0_26 = arith.constant 0 : index
      %c1 = arith.constant 1 : index
      %c0_27 = arith.constant 0 : index
      %35 = vector.load %arg4[%c0_26, %c1, %c0_27] : memref<1x2x128xf32, #tpu.memory_space<vmem>>, vector<1x1x128xf32>
      %36 = vector.shape_cast %35 : vector<1x1x128xf32> to vector<1x128xf32>
      %37 = vector.shape_cast %34 : vector<1x128xf32> to vector<1x1x128xf32>
      tpu.vector_store %arg4[%c0_26, %c1, %c0_27], %37 {strides = array<i32>} : memref<1x2x128xf32, #tpu.memory_space<vmem>>, vector<1x1x128xf32>,
    } else {
    }
    return
  }
  func.func @transform_0(%arg0: i32, %arg1: i32) -> (i32, i32) {
    %c1_i32 = arith.constant 1 : i32
    %0 = arith.muli %arg0, %c1_i32 : i32
    %1 = arith.addi %0, %arg1 : i32
    %c0_i32 = arith.constant 0 : i32
    %c0_i32_0 = arith.constant 0 : i32
    return %1, %c0_i32 : i32, i32
  }
  func.func @transform_1(%arg0: i32, %arg1: i32) -> (i32, i32) {
    %c1_i32 = arith.constant 1 : i32
    %0 = arith.muli %arg0, %c1_i32 : i32
    %1 = arith.addi %0, %arg1 : i32
    %c0_i32 = arith.constant 0 : i32
    %c0_i32_0 = arith.constant 0 : i32
    return %1, %c0_i32 : i32, i32
  }
  func.func @transform_2(%arg0: i32, %arg1: i32) -> (i32, i32, i32) {
    %c0_i32 = arith.constant 0 : i32
    %c0_i32_0 = arith.constant 0 : i32
    %c0_i32_1 = arith.constant 0 : i32
    return %arg0, %c0_i32, %c0_i32_0 : i32, i32, i32
  }
}

</mosaic_0001>

<bundles_post_ra>
// kernel: tpu_custom_call.1
= control target key start
LH: loop header
LB: loop body
LE: loop exit
PB: predicated region body
PF: predicated region fallthrough
CT: control target
= control target key end

     0   :  { %7 = vsyncpa [#allocation5], 0  ;;  %s203_s0 = inlined_call_operand.hbm [shape: f32[4,128], index: 0, kind: input, shape index: {}]   ;;  %s204_s1 = inlined_call_operand.hbm [shape: f32[4,128], index: 1, kind: input, shape index: {}]   ;;  %s205_s2 = inlined_call_operand.hbm [shape: f32[1,2,128], index: 2, kind: output, shape index: {}]  }
   0x1   :  { %8 = vsyncpa [#allocation8], 0 }
   0x2   :  { %9 = vsyncpa [#allocation6], 0  ;;  %s175_s9 = smov [#allocation4]   ;;  %s176_s11 = smov [#allocation7]  }
   0x3   :  { %s19_s10 = sshll.u32 %s175_s9, 4  ;;  %s32_s12 = sshll.u32 %s176_s11, 4  ;;  %s20_s10 = int_to_ptr.vmem [resolvable:$true] %s19_s10  ;;  %s33_s12 = int_to_ptr.vmem [resolvable:$true] %s32_s12 }
   0x4   :  { %s117_s13 = scalar_lea.vmem %s20_s10, 64  ;;  %p122_p1 = scmp.lt.s32.totalorder %s20_s10, %s20_s10 }
   0x5   :  { %p118_p0 = scmp.ne.s32.totalorder %s20_s10, %s117_s13  ;;  %p123_p2 = scmp.lt.s32.totalorder %s117_s13, %s117_s13 }
   0x7   :  { %p124_p3 = por %p123_p2, %p122_p1 }
   0x9   :  { %p125_p4 = pnand %p124_p3, %p118_p0 }
   0xb   :  { %128 = shalt.err (!%p125_p4)
}
   0xc   :  { %22 = dma.hbm_to_vmem [thread:$0]  %s203_s0, 64, %s20_s10, [#allocation5]  }
   0xd   :  { %s137_s16 = scalar_lea.vmem %s33_s12, 64  ;;  %p142_p6 = scmp.lt.s32.totalorder %s33_s12, %s33_s12 }
   0xe   :  { %p138_p5 = scmp.ne.s32.totalorder %s33_s12, %s137_s16  ;;  %p143_p7 = scmp.lt.s32.totalorder %s137_s16, %s137_s16 }
  0x10   :  { %p144_p8 = por %p143_p7, %p142_p6 }
  0x12   :  { %p145_p9 = pnand %p144_p8, %p138_p5 }
  0x14   :  { %148 = shalt.err (!%p145_p9)
}
  0x15   :  { %35 = dma.hbm_to_vmem [thread:$0]  %s204_s1, 64, %s33_s12, [#allocation8]  }
  0x16   :  { %169 = dma.done.wait [#allocation5], 64  }
  0x17   :  { %170 = vsyncadd [#allocation5], 4294967232 }
  0x18   :  { %171 = dma.done.wait [#allocation8], 64  }
  0x19   :  { %172 = vsyncadd [#allocation8], 4294967232  ;;  %v177_v0 = vmov 0.0   ;;  %v50_v1 = vld [vmem:[#allocation7] sm:$0xf]  ;;  %vm59_vm0 = vcmask 1043456  }
  0x1a   :  { %48 = vst [vmem:[#allocation2] sm:$0x1] %v177_v0  ;;  %49 = vst [vmem:[#allocation3] sm:$0x1] %v177_v0  ;;  %vm52_vm1 = vcmp.gt.f32.partialorder %v50_v1, 0.0  ;;  %v53_v2 = vmin.f32 %v50_v1, 100.0 }
  0x1b   :  { %v51_v3 = vld [vmem:[#allocation4] sm:$0xf]  ;;  %v104_v4 = vsel %vm52_vm1, 1.0, %v177_v0  ;;  %s178_s0 = smov [#allocation9]  }
  0x1c   :  { %v54_v5 = vmul.f32 0.01, %v53_v2  ;;  %v72_v6 = vsel %vm59_vm0, %v104_v4, 0.0  ;;  %s94_s1 = sshll.u32 %s178_s0, 4  ;;  %s95_s1 = int_to_ptr.vmem [resolvable:$true] %s94_s1 }
  0x1d   :  { %v73_v7 = vrot.slane %v72_v6, 4  ;;  %s149_s19 = scalar_lea.vmem %s95_s1, 32  ;;  %p154_p11 = scmp.lt.s32.totalorder %s95_s1, %s95_s1 }
  0x1e   :  { %v55_v8 = vsub.f32 %v54_v5, %v51_v3  ;;  %p150_p10 = scmp.ne.s32.totalorder %s95_s1, %s149_s19  ;;  %p155_p12 = scmp.lt.s32.totalorder %s149_s19, %s149_s19 }
  0x1f   :  { %v74_v9 = vadd.f32 %v73_v7, %v72_v6 }
  0x20   :  { %v56_v10 = vand.u32 2147483647, %v55_v8  ;;  %p156_p13 = por %p155_p12, %p154_p11 }
  0x21   :  { %v75_v11 = vrot.slane %v74_v9, 2  ;;  %v69_v18 = vld [vmem:[#allocation3] sm:$0x1]  ;;  %v58_v24 = vld [vmem:[#allocation2] sm:$0x1] }
  0x22   :  { %v57_v12 = vsel %vm52_vm1, %v56_v10, 0.0  ;;  %p157_p0 = pnand %p156_p13, %p150_p10 }
  0x23   :  { %v60_v13 = vsel %vm59_vm0, %v57_v12, 0.0  ;;  %v76_v14 = vadd.f32 %v75_v11, %v74_v9 }
  0x24   :  { %v61_v15 = vrot.slane %v60_v13, 4 }
  0x25   :  { %v77_v16 = vrot.slane %v76_v14, 1 }
  0x26   :  { %v62_v17 = vadd.f32 %v61_v15, %v60_v13 }
  0x27   :  { %v78_v19 = vadd.f32 %v77_v16, %v76_v14 }
  0x28   :  { %v63_v20 = vrot.slane %v62_v17, 2 }
  0x29   :  { %v79_v21 = vadd.f32 %v78_v19, %v69_v18 }
  0x2a   :  { %v64_v22 = vadd.f32 %v63_v20, %v62_v17 }
  0x2b   :  { %80 = vst [vmem:[#allocation3] sm:$0x1] %v79_v21 }
  0x2c   :  { %v65_v23 = vrot.slane %v64_v22, 1 }
  0x2e   :  { %v66_v25 = vadd.f32 %v65_v23, %v64_v22 }
  0x30   :  { %v67_v26 = vadd.f32 %v66_v25, %v58_v24 }
  0x32   :  { %68 = vst [vmem:[#allocation2] sm:$0x1] %v67_v26  ;;  %v86_v27 = vld [vmem:[#allocation3] sm:$0x1] }
  0x33   :  { %87 = vst [vmem:[#allocation9 + $0x1] sm:$0x1] %v86_v27 }
  0x39   :  { %v84_v28 = vld [vmem:[#allocation2] sm:$0x1] }
  0x3a   :  { %85 = vst [vmem:[#allocation9] sm:$0x1] %v84_v28 }
  0x3b   :  { %160 = shalt.err (!%p157_p0)
}
  0x3c   :  { %97 = dma.vmem_to_hbm [thread:$0]  %s95_s1, 32, %s205_s2, [#allocation6]  }
  0x3d   :  { %173 = dma.done.wait [#allocation6], 32  }
  0x3e   :  { %174 = vsyncadd [#allocation6], 4294967264 }
  0x3f   :  { %101 = vsyncpa [#allocation5], 1 }
  0x40   :  { %102 = vsyncpa [#allocation8], 1 }
  0x41   :  { %103 = vsyncpa [#allocation6], 1 }

</bundles_post_ra>
